<compile_context>
chip_gen: v7x
topology: tpu7x:2x2x1
jax: 0.10.0
libtpu: 0.0.40
codegen_flags: <defaults>
</compile_context>

<pallas_src>
import jax
import jax.numpy as jnp
from jax.experimental import pallas as pl
from jax.experimental.pallas import tpu as pltpu

EPS = 1e-5
HI = jax.lax.Precision.HIGHEST


# ---------------------------------------------------------------------------
# Pallas kernel: y_tile = W_eff^T @ x_tile + b_eff
#   x_ref : (1, C, ts)   channels on sublanes, spatial on lanes
#   wt_ref: (C, C)       W_eff^T
#   b_ref : (C, 1)       bias (broadcast over lanes)
# ---------------------------------------------------------------------------
def _fused_kernel(x_ref, wt_ref, b_ref, o_ref):
    y = jnp.dot(wt_ref[...], x_ref[0], preferred_element_type=jnp.float32)
    o_ref[0] = (y + b_ref[...]).astype(o_ref.dtype)


def node_attention_pool_head(x, w_eff, b_eff, *, ts_max=2048):
    """x: (B, C, T, H, W) f32;  w_eff: (C, C);  b_eff: (C,).  -> (B, C, T, H, W)."""
    B, C, T, H, W = x.shape
    S = T * H * W
    x3 = x.reshape(B, C, S)                          # native layout; no transpose

    # Spatial tile: largest multiple-of-128 divisor of S up to ts_max, else the
    # full extent (a full-extent block is always a legal block shape).
    ts = S
    if S > ts_max:
        for cand in range(ts_max, 0, -128):
            if S % cand == 0:
                ts = cand
                break

    wt = jnp.asarray(w_eff, jnp.float32).T           # (C, C) = W_eff^T
    bc = jnp.asarray(b_eff, jnp.float32).reshape(C, 1)

    grid = (B, S // ts)                              # both axes fully independent
    out = pl.pallas_call(
        _fused_kernel,
        out_shape=jax.ShapeDtypeStruct((B, C, S), x.dtype),
        grid_spec=pltpu.PrefetchScalarGridSpec(
            num_scalar_prefetch=0,
            grid=grid,
            in_specs=[
                pl.BlockSpec((1, C, ts), lambda b, s: (b, 0, s)),   # x tile
                pl.BlockSpec((C, C), lambda b, s: (0, 0)),          # W_eff^T (fetched once)
                pl.BlockSpec((C, 1), lambda b, s: (0, 0)),          # bias     (fetched once)
            ],
            out_specs=pl.BlockSpec((1, C, ts), lambda b, s: (b, 0, s)),
        ),
        compiler_params=pltpu.CompilerParams(
            dimension_semantics=("parallel", "parallel")),
    )(x3, wt, bc)

    return out.reshape(B, C, T, H, W)


# ---------------------------------------------------------------------------
# Deterministic parameter construction (plain JAX glue).  BatchNorm layers are
# used in inference form: y = g*(x-rm)/sqrt(rv+eps)+b  ->  per-feature affine.
# ---------------------------------------------------------------------------
def _bn_affine(key, n):
    kg, kb, km, kv = jax.random.split(key, 4)
    gamma = jax.random.uniform(kg, (n,), minval=0.8, maxval=1.2)
    beta = 0.1 * jax.random.normal(kb, (n,))
    rmean = 0.1 * jax.random.normal(km, (n,))
    rvar = jax.random.uniform(kv, (n,), minval=0.5, maxval=1.5)
    scale = gamma / jnp.sqrt(rvar + EPS)
    shift = beta - rmean * scale
    return scale, shift


def _linear(key, fan_in, fan_out):
    kw, kb = jax.random.split(key)
    bound = 1.0 / jnp.sqrt(fan_in)
    w = jax.random.uniform(kw, (fan_out, fan_in), minval=-bound, maxval=bound)
    b = jax.random.uniform(kb, (fan_out,), minval=-bound, maxval=bound)
    return w, b


def init_raw_params(key, C, c_inter, n_nodes):
    knodes, k_xbn, k_bn1, k_l1, k_bn2, k_abn, k_l2, k_bn3 = jax.random.split(key, 8)
    # utils.generate_centroids(n_nodes, c_inter) replaced by deterministic uniforms.
    nodes = jax.random.uniform(knodes, (n_nodes, c_inter))
    sx, bx = _bn_affine(k_xbn, C)            # x_bn       : BatchNorm3d(C)
    s1, b1 = _bn_affine(k_bn1, c_inter)      # nodes_bn_1 : BatchNorm1d(c_inter)
    wl1, bl1 = _linear(k_l1, c_inter, C)     # nodes_linear_1
    s2, b2 = _bn_affine(k_bn2, n_nodes)      # nodes_bn_2 : per-node (dim=0)
    sa, ba = _bn_affine(k_abn, n_nodes)      # alpha_bn   : per-node (dim=3)
    wl2, bl2 = _linear(k_l2, c_inter, C)     # nodes_linear_2
    s3, b3 = _bn_affine(k_bn3, C)            # nodes_bn_3 : BatchNorm1d(C)
    f32 = jnp.float32
    raw = dict(nodes=nodes, sx=sx, bx=bx, s1=s1, b1=b1, wl1=wl1, bl1=bl1,
               s2=s2, b2=b2, sa=sa, ba=ba, wl2=wl2, bl2=bl2, s3=s3, b3=b3)
    return {k: jnp.asarray(v, f32) for k, v in raw.items()}


def node_branches(p):
    """W1 = bn2(linear1(bn1(nodes)))  and  W2 = bn3(linear2(nodes)); both (N, C)."""
    nodes = p["nodes"]
    n1 = nodes * p["s1"][None, :] + p["b1"][None, :]
    n1 = jnp.dot(n1, p["wl1"].T, precision=HI) + p["bl1"][None, :]
    w1 = n1 * p["s2"][:, None] + p["b2"][:, None]        # per-node affine (dim=0)
    n2 = jnp.dot(nodes, p["wl2"].T, precision=HI) + p["bl2"][None, :]
    w2 = n2 * p["s3"][None, :] + p["b3"][None, :]        # per-channel affine
    return w1, w2


def fold_params(p):
    """Exact affine fold of the whole head into (W_eff (C,C), b_eff (C,))."""
    w1, w2 = node_branches(p)
    w_eff = jnp.dot(p["sx"][:, None] * w1.T,
                    p["sa"][:, None] * w2, precision=HI)                  # (C, C)
    b_eff = jnp.dot(jnp.dot(p["bx"], w1.T, precision=HI) * p["sa"] + p["ba"],
                    w2, precision=HI)                                     # (C,)
    return w_eff, b_eff


# ---------------------------------------------------------------------------
# Pure-JAX reference: the UN-folded, step-by-step forward (validates both the
# algebraic fold and the kernel).
# ---------------------------------------------------------------------------
def reference(x, p):
    w1, w2 = node_branches(p)
    xb = x * p["sx"][None, :, None, None, None] + p["bx"][None, :, None, None, None]
    alpha = jnp.einsum("bcthw,nc->bthwn", xb, w1, precision=HI)
    alpha = alpha * p["sa"] + p["ba"]
    return jnp.einsum("bthwn,nc->bcthw", alpha, w2, precision=HI)


if __name__ == "__main__":
    B, C, T, H, W = 2, 16, 4, 8, 8
    c_inter, n_nodes = 8, 8

    key = jax.random.PRNGKey(0)
    kx, kp = jax.random.split(key)
    x = jax.random.normal(kx, (B, C, T, H, W), dtype=jnp.float32)

    params = init_raw_params(kp, C, c_inter, n_nodes)
    w_eff, b_eff = fold_params(params)

    y = node_attention_pool_head(x, w_eff, b_eff)
    y = jax.block_until_ready(y)

    y_ref = reference(x, params)
    assert y.shape == (B, C, T, H, W)
    assert jnp.allclose(y, y_ref, atol=1e-3, rtol=1e-3), "mismatch vs reference"

    print("KERNEL_OK")
</pallas_src>

<mosaic_0001>
module attributes {stable_mosaic.version = 11 : i64} {
  func.func @_fused_kernel(%arg0: i32, %arg1: i32, %arg2: memref<1x16x256xf32, #tpu.memory_space<vmem>>, %arg3: memref<16x16xf32, #tpu.memory_space<vmem>>, %arg4: memref<16x1xf32, #tpu.memory_space<vmem>>, %arg5: memref<1x16x256xf32, #tpu.memory_space<vmem>>) attributes {dimension_semantics = [#tpu.dimension_semantics<parallel>, #tpu.dimension_semantics<parallel>], iteration_bounds = array<i64: 2, 1>, scalar_prefetch = 0 : i64, scratch_operands = 0 : i64, tpu.core_type = #tpu.core_type<tc>, window_params = [{transform_indices = @transform_0, window_bounds = array<i64: 1, 16, 256>}, {pipeline_mode = #tpu.pipeline_mode<synchronous>, transform_indices = @transform_1, window_bounds = array<i64: 16, 16>}, {pipeline_mode = #tpu.pipeline_mode<synchronous>, transform_indices = @transform_2, window_bounds = array<i64: 16, 1>}, {transform_indices = @transform_3, window_bounds = array<i64: 1, 16, 256>}]} {
    %c0 = arith.constant 0 : index
    %c0_0 = arith.constant 0 : index
    %0 = vector.load %arg3[%c0, %c0_0] : memref<16x16xf32, #tpu.memory_space<vmem>>, vector<16x16xf32>
    %c0_1 = arith.constant 0 : index
    %c0_2 = arith.constant 0 : index
    %c0_3 = arith.constant 0 : index
    %1 = vector.load %arg2[%c0_1, %c0_2, %c0_3] : memref<1x16x256xf32, #tpu.memory_space<vmem>>, vector<1x16x256xf32>
    %2 = vector.shape_cast %1 : vector<1x16x256xf32> to vector<16x256xf32>
    %cst = arith.constant dense<0.000000e+00> : vector<16x256xf32>
    %3 = tpu.matmul %0, %2, %cst {dimension_numbers = #tpu.dot_dimension_numbers<[1], [0], [0], [1], [0, 0, 1, 1], [], []>} : vector<16x16xf32>, vector<16x256xf32>, vector<16x256xf32> -> vector<16x256xf32>
    %c0_4 = arith.constant 0 : index
    %c0_5 = arith.constant 0 : index
    %4 = vector.load %arg4[%c0_4, %c0_5] : memref<16x1xf32, #tpu.memory_space<vmem>>, vector<16x1xf32>
    %5 = vector.broadcast %4 : vector<16x1xf32> to vector<16x256xf32>
    %6 = arith.addf %3, %5 : vector<16x256xf32>
    %c0_6 = arith.constant 0 : index
    %c0_7 = arith.constant 0 : index
    %c0_8 = arith.constant 0 : index
    %7 = vector.load %arg5[%c0_6, %c0_7, %c0_8] : memref<1x16x256xf32, #tpu.memory_space<vmem>>, vector<1x16x256xf32>
    %8 = vector.shape_cast %7 : vector<1x16x256xf32> to vector<16x256xf32>
    %9 = vector.shape_cast %6 : vector<16x256xf32> to vector<1x16x256xf32>
    tpu.vector_store %arg5[%c0_6, %c0_7, %c0_8], %9 {strides = array<i32>} : memref<1x16x256xf32, #tpu.memory_space<vmem>>, vector<1x16x256xf32>,
    return
  }
  func.func @transform_0(%arg0: i32, %arg1: i32) -> (i32, i32, i32) {
    %c0_i32 = arith.constant 0 : i32
    %c0_i32_0 = arith.constant 0 : i32
    return %arg0, %c0_i32, %arg1 : i32, i32, i32
  }
  func.func @transform_1(%arg0: i32, %arg1: i32) -> (i32, i32) {
    %c0_i32 = arith.constant 0 : i32
    %c0_i32_0 = arith.constant 0 : i32
    %c0_i32_1 = arith.constant 0 : i32
    return %c0_i32, %c0_i32_0 : i32, i32
  }
  func.func @transform_2(%arg0: i32, %arg1: i32) -> (i32, i32) {
    %c0_i32 = arith.constant 0 : i32
    %c0_i32_0 = arith.constant 0 : i32
    %c0_i32_1 = arith.constant 0 : i32
    return %c0_i32, %c0_i32_0 : i32, i32
  }
  func.func @transform_3(%arg0: i32, %arg1: i32) -> (i32, i32, i32) {
    %c0_i32 = arith.constant 0 : i32
    %c0_i32_0 = arith.constant 0 : i32
    return %arg0, %c0_i32, %arg1 : i32, i32, i32
  }
}

</mosaic_0001>

<bundles_post_ra>
// kernel: tpu_custom_call.1
= control target key start
LH: loop header
LB: loop body
LE: loop exit
PB: predicated region body
PF: predicated region fallthrough
CT: control target
= control target key end

     0   :  { %8 = vsyncpa [#allocation3], 0  ;;  %s841_s0 = inlined_call_operand.hbm [shape: f32[2,16,256], index: 0, kind: input, shape index: {}]   ;;  %s842_s1 = inlined_call_operand.vmem [shape: f32[16,16], index: 1, kind: input, shape index: {}]   ;;  %s843_s2 = inlined_call_operand.vmem [shape: f32[16,1], index: 2, kind: input, shape index: {}]   ;;  %s844_s3 = inlined_call_operand.hbm [shape: f32[2,16,256], index: 3, kind: output, shape index: {}]  }
   0x1   :  { %10 = vsyncpa [#allocation3 + $0x1], 0 }
   0x2   :  { %11 = vsyncpa [#allocation4], 0 }
   0x3   :  { %13 = vsyncpa [#allocation4 + $0x1], 0  ;;  %s654_s12 = smov 0   ;;  %s656_s13 = smov 0  }
   0x4   :  { %s658_s14 = smov 0   ;;  %s660_s15 = smov 0  }
   0x5   :  { %s662_s16 = smov 0   ;;  %s664_s17 = smov 0  }
   0x6 LB: > { %s418_s18 = sadd.s32 4294967295, %s624_s17   ;;  %s419_s19 = sadd.s32 4294967294, %s624_s17   ;;  %s624_s17 = sphi %s664_s17, %s19_s17   ;;  %s620_s16 = sphi %s662_s16, %s859_s16   ;;  %s616_s15 = sphi %s660_s15, %s858_s15   ;;  %s612_s14 = sphi %s658_s14, %s857_s14   ;;  %s608_s13 = sphi %s656_s13, %s856_s13   ;;  %s604_s12 = sphi %s654_s12, %s855_s12  }
   0x7   : > { %s31_s20 = sadd.s32 1, %s620_s16  ;;  %s40_s21 = sadd.s32 1, %s612_s14 }
   0x8   : > { %p33_p0 = scmp.ge.s32.totalorder %s31_s20, 2  ;;  %p47_p1 = scmp.ne.s32.totalorder %s612_s14, %s608_s13 }
   0x9   : > { %p48_p2 = scmp.eq.s32.totalorder %s624_s17, 0  ;;  %p53_p3 = scmp.ne.s32.totalorder %s608_s13, %s604_s12 }
   0xa   : > { %s861_s20 = smov (%p33_p0, %s31_s20), 0  ;;  %p54_p5 = scmp.eq.s32.totalorder %s418_s18, 0 }
   0xb   : > { %p695_p4 = por %p48_p2, %p47_p1  ;;  %s35_s23 = ssub.s32 %s620_s16, %s861_s20 }
   0xc   : > { %p121_p6 = scmp.eq.s32.totalorder %s418_s18, 1  ;;  %p38_p7 = scmp.eq.s32.totalorder %s35_s23, 0 }
   0xd   : > { %p701_p8 = por %p54_p5, %p53_p3  ;;  %p127_p10 = scmp.eq.s32.totalorder %s419_s19, 1 }
   0xe   : > { %p705_p9 = por %p121_p6, %p47_p1  ;;  %p455_p13 = scmp.lt.s32.totalorder %s624_s17, 2 }
   0xf   : > { %s710_s26 = scalar_select %p38_p7, %s612_s14, %s40_s21  }
  0x10   : > { %s848_s25 = scalar_select %p705_p9, 1, 0 }
  0x11   : > { %p712_p11 = por %p127_p10, %p53_p3  ;;  %s153_s28 = sand.u32 1, %s612_s14  }
  0x12   : > { %s422_s29 = sshll.u32 %s153_s28, 5  ;;  %s435_s30 = sshll.u32 %s620_s16, 9 }
  0x13   : > { %s849_s27 = scalar_select %p712_p11, 1, 0 }
  0x14   : > { %s723_s6 = scalar_lea.hbm %s841_s0, %s435_s30  ;;  %s157_s7 = scalar_lea.vmem [#allocation2], %s422_s29 }
  0x15   : > { %s166_s8 = sshll.u32 %s157_s7, 4  ;;  %p729_p0 = pnand %p455_p13, %p695_p4  ;;  %s725_s8 = int_to_ptr.vmem [resolvable:$true] %s166_s8 }
  0x16   : > { %s734_s10 = scalar_lea.sflag [#allocation3], %s153_s28  ;;  %s512_s11 = scalar_lea.hbm %s723_s6, 512 }
  0x17   : > { %p513_p2 = scmp.ne.s32.totalorder %s723_s6, %s512_s11  ;;  %p514_p3 = pneg %p729_p0 }
  0x18   : > { %s517_s21 = scalar_lea.hbm %s841_s0, 1024  ;;  %p518_p4 = scmp.lt.u32.totalorder %s723_s6, %s841_s0 }
  0x19   : > { %p515_p5 = pnand %p514_p3, %p513_p2  ;;  %p519_p7 = scmp.lt.u32.totalorder %s517_s21, %s512_s11 }
  0x1a   : > { %p521_p13 = scmp.lt.u32.totalorder %s512_s11, %s723_s6 }
  0x1b   : > { %p516_p6 = pneg %p515_p5  ;;  %p520_p10 = por %p519_p7, %p518_p4 }
  0x1d   : > { %p522_p12 = por %p521_p13, %p520_p10 }
  0x1f   : > { %p523_p1 = pnand %p522_p12, %p516_p6 }
  0x21   : > { %526 = shalt.err (!%p523_p1)
}
  0x22   : > { %s527_s28 = scalar_lea.vmem %s725_s8, 512  ;;  %s626_s29 = smov [#allocation2]  }
  0x23   : > { %p528_p2 = scmp.ne.s32.totalorder %s725_s8, %s527_s28  ;;  %s532_s30 = sshll.u32 %s626_s29, 4  ;;  %s533_s30 = int_to_ptr.vmem [resolvable:$false] %s532_s30 }
  0x24   : > { %s534_s4 = scalar_lea.vmem %s533_s30, 1024  ;;  %p535_p9 = scmp.lt.s32.totalorder %s725_s8, %s533_s30 }
  0x25   : > { %p530_p5 = pnand %p528_p2, %p514_p3  ;;  %p536_p4 = scmp.lt.s32.totalorder %s534_s4, %s527_s28 }
  0x27   : > { %p531_p11 = pneg %p530_p5  ;;  %p537_p7 = por %p536_p4, %p535_p9 }
  0x29   : > { %p538_p10 = pnand %p537_p7, %p531_p11 }
  0x2b   : > { %541 = shalt.err (!%p538_p10)
}
  0x2c   : > { %s627_s5 = smov 256   ;;  %s628_s7 = smov 16  }
  0x2d   : > { %450 = dma.hbm_to_vmem [thread:$0]  (!%p729_p0), %s723_s6, 512, %s725_s8, %s734_s10, %s627_s5, %s627_s5, %s628_s7  }
  0x2e   : > { %p174_p12 = scmp.lt.s32.totalorder %s624_s17, 3  ;;  %p851_p1 = scmp.ge.s32.totalorder %s624_s17, 1 }
  0x30   : > { %p175_p3 = pnand %p851_p1, %p174_p12 }
  0x31   : > { %s766_s11 = sand.u32 (!%p175_p3), 1, %s608_s13  }
  0x32   : > { %178 = sbr.rel (%p175_p3) target bundleno = 295 (0x127), region = 32  ;;  %s426_s18 = sshll.u32 (!%p175_p3), %s766_s11, 5 }
  0x33   : > { %s181_s19 = scalar_lea.sflag (!%p175_p3), [#allocation3], %s766_s11  ;;  %s184_s21 = scalar_lea.vmem (!%p175_p3), [#allocation2], %s426_s18 }
  0x39   : > { %595 = dma.done.wait (%p701_p8), %s181_s19, 512  }
  0x3a   : > { %597 = vsyncadd (%p701_p8), %s181_s19, 4294966784  ;;  %v629_v0 = vmov 0.0   ;;  %v630_v1 = vmov 0   ;;  %v212_v2 = vld [vmem:[%s184_s21 + $0x8] sm:$0xff]  ;;  %v214_v3 = vld [vmem:[%s184_s21 + $0x18] sm:$0xff]  ;;  %vm227_vm0 = vcmask 130048  }
  0x3b   : > { %298 = vmatprep.mubr.f32.mxu0 %v629_v0  ;;  %304 = vmatprep.mubr.f32.mxu1 %v629_v0  ;;  %v211_v4 = vld [vmem:[%s184_s21] sm:$0xff]  ;;  %v437_v5 = vpack.c.bf16 %v214_v3, %v212_v2  ;;  %v213_v6 = vld [vmem:[%s184_s21 + $0x10] sm:$0xff]  ;;  %v210_v10 = vld [vmem:[%s842_s1 + $0x8] sm:$0xff]  ;;  %s206_s29 = scalar_lea.vmem [#allocation5], %s426_s18  ;;  %s436_s4 = sshll.u32 %s616_s15, 9 }
  0x3c   : > { %511 = vset.pattern.permute.xlu0 %v630_v1  ;;  %v439_v7 = vpack.c.bf16 %v213_v6, %v211_v4  ;;  %v215_v8 = vld [vmem:[%s843_s2] sm:$0xff]  ;;  %v216_v11 = vld [vmem:[%s843_s2 + $0x8] sm:$0xff]  ;;  %s331_s30 = sshll.u32 %s206_s29, 4  ;;  %s792_s19 = scalar_lea.hbm %s844_s3, %s436_s4  ;;  %s787_s30 = int_to_ptr.vmem [resolvable:$true] %s331_s30 }
  0x3d   : > { %438 = vmatprep.subr.bf16.mxu0 %v437_v5  ;;  %441 = vmatprep.subr.bf16.mxu1 %v437_v5  ;;  %v209_v9 = vld [vmem:[%s842_s1] sm:$0xff]  ;;  %s316_s15 = scalar_lea.sflag [#allocation4], %s766_s11  ;;  %s542_s18 = scalar_lea.vmem %s787_s30, 512 }
  0x3e   : > { %440 = vmatpush1.bf16.msra.mxu0 %v439_v7  ;;  %442 = vmatpush1.bf16.msra.mxu1 %v439_v7  ;;  %p543_p8 = scmp.ne.s32.totalorder %s787_s30, %s542_s18  ;;  %p852_p9 = scmp.ne.s32.totalorder %s848_s25, 0 }
  0x3f   : > { %219 = vperm.xlu0 %511, %v215_v8   ;;  %s631_s21 = smov [#allocation5]  }
  0x40   : > { %p544_p11 = pnand %p543_p8, %p852_p9  ;;  %s546_s6 = sshll.u32 %s631_s21, 4  ;;  %s547_s6 = int_to_ptr.vmem [resolvable:$false] %s546_s6 }
  0x41   : > { %428 = vmatmul.mubr.msk.f32.vlgmr.msra.gmra.mrb[0].mxu0 %vm227_vm0, %v209_v9  ;;  %429 = vmatmul.mubr.msk.f32.vlgmr.msra.gmra.mrb[0].mxu1 %vm227_vm0, %v210_v10  ;;  %s548_s8 = scalar_lea.vmem %s547_s6, 1024  ;;  %p549_p6 = scmp.lt.s32.totalorder %s787_s30, %s547_s6 }
  0x42   : > { %p545_p0 = pneg %p544_p11  ;;  %p550_p13 = scmp.lt.s32.totalorder %s548_s8, %s542_s18 }
  0x43   : > { %224 = vperm.xlu0 %511, %v216_v11  }
  0x44   : > { %p551_p2 = por %p550_p13, %p549_p6 }
  0x46   : > { %p552_p5 = pnand %p551_p2, %p545_p0 }
  0xbe   : > { %v220_v12 = vpop.permute.xlu0 %219 }
  0xc2   : > { %v225_v13 = vpop.permute.xlu0 %224 }
 0x114   : > { %v300_v14 = vpop.f32.mrb[0].mxu0  ;;  %v306_v15 = vpop.f32.mrb[0].mxu1 }
 0x115   : > { %v301_v16 = vadd.f32 %v300_v14, %v220_v12  ;;  %v307_v17 = vadd.f32 %v306_v15, %v225_v13  ;;  %v302_v18 = vpop.f32.mrb[1].mxu0  ;;  %v308_v19 = vpop.f32.mrb[1].mxu1 }
 0x116   : > { %v303_v20 = vadd.f32 %v302_v18, %v220_v12  ;;  %v309_v21 = vadd.f32 %v308_v19, %v225_v13 }
 0x117   : > { %311 = vst [vmem:[%s206_s29] sm:$0xff] %v301_v16  ;;  %313 = vst [vmem:[%s206_s29 + $0x10] sm:$0xff] %v307_v17 }
 0x118   : > { %312 = vst [vmem:[%s206_s29 + $0x8] sm:$0xff] %v303_v20  ;;  %314 = vst [vmem:[%s206_s29 + $0x18] sm:$0xff] %v309_v21 }
 0x119   : > { %555 = shalt.err (!%p552_p5)
}
 0x11a   : > { %s556_s24 = scalar_lea.hbm %s792_s19, 512  ;;  %s560_s22 = scalar_lea.hbm %s844_s3, 1024 }
 0x11b   : > { %p557_p4 = scmp.ne.s32.totalorder %s792_s19, %s556_s24  ;;  %p561_p12 = scmp.lt.u32.totalorder %s792_s19, %s844_s3 }
 0x11c   : > { %p562_p1 = scmp.lt.u32.totalorder %s560_s22, %s556_s24  ;;  %p564_p8 = scmp.lt.u32.totalorder %s556_s24, %s792_s19 }
 0x11d   : > { %p558_p7 = pnand %p557_p4, %p852_p9 }
 0x11e   : > { %p563_p3 = por %p562_p1, %p561_p12 }
 0x11f   : > { %p559_p10 = pneg %p558_p7 }
 0x120   : > { %p565_p11 = por %p564_p8, %p563_p3 }
 0x122   : > { %p566_p0 = pnand %p565_p11, %p559_p10 }
 0x124   : > { %569 = shalt.err (!%p566_p0)
}
 0x125   : > { %s632_s29 = smov 256   ;;  %s633_s4 = smov 16  }
 0x126   : > { %445 = dma.vmem_to_hbm [thread:$0]  (%p852_p9), %s787_s30, 512, %s792_s19, %s316_s15, %s632_s29, %s632_s29, %s633_s4  }
 0x127 PF: > { %s346_s5 = sand.u32 1, %s604_s12   ;;  %p853_p6 = scmp.ne.s32.totalorder %s849_s27, 0 }
 0x128   : > { %p854_p13 = scmp.ge.s32.totalorder %s624_s17, 2  ;;  %s347_s7 = scalar_lea.sflag [#allocation4], %s346_s5 }
 0x12a   : > { %p452_p2 = pnand %p854_p13, %p853_p6 }
 0x12c   : > { %599 = dma.done.wait (!%p452_p2), %s347_s7, 512  }
 0x12d   : > { %601 = vsyncadd (!%p452_p2), %s347_s7, 4294966784  ;;  %s19_s17 = sadd.s32 1, %s624_s17   ;;  %s855_s12 = smov %s608_s13 }
 0x12e   : > { %p16_p5 = scmp.ge.s32.totalorder %s19_s17, 4   ;;  %s856_s13 = smov %s612_s14 }
 0x12f   : > { %s857_s14 = smov %s710_s26  ;;  %s858_s15 = smov %s620_s16 }
 0x130   : > { %s859_s16 = smov %s861_s20  ;;  %18 = sbr.rel (!%p16_p5) target bundleno = 6 (0x6), region = 77 }
 0x137   :  { %352 = vsyncpa [#allocation3], 1 }
 0x138   :  { %354 = vsyncpa [#allocation3 + $0x1], 1 }
 0x139   :  { %355 = vsyncpa [#allocation4], 1 }
 0x13a   :  { %357 = vsyncpa [#allocation4 + $0x1], 1 }

</bundles_post_ra>
